<compile_context>
chip_gen: v5e
topology: v5e:2x2
jax: 0.10.0
libtpu: 0.0.40
codegen_flags: <defaults>
</compile_context>

<pallas_src>
import functools

import jax
import jax.numpy as jnp
from jax import lax
from jax.experimental import pallas as pl
from jax.experimental.pallas import tpu as pltpu

MAX_NUM = -32000.0
BN_EPS = 1e-5
NORM_EPS = 1e-12           # torch.nn.functional.normalize default eps
MXU_DTYPE = jnp.bfloat16   # MXU operand dtype (f32 accumulation everywhere)
VMEM_LIMIT = 32 * 1024 * 1024  # safe scoped-VMEM budget on v5e/v6e/v7x


def _pick_tile(n, candidates):
    """Largest candidate tile that divides n, else the full extent."""
    for c in candidates:
        if n >= c and n % c == 0:
            return c
    return n


# ----------------------------------------------------------------------------
# Phase 1: 1x1-conv stem + ReLU + global average pool  ->  (B, M)
# ----------------------------------------------------------------------------
def _pool_kernel(x_ref, wct_ref, bc_ref, pooled_ref, acc_ref, *, inv_s):
    s_idx = pl.program_id(1)

    @pl.when(s_idx == 0)
    def _init():
        acc_ref[...] = jnp.zeros_like(acc_ref)

    x = x_ref[0].astype(MXU_DTYPE)                     # (C, ts)
    # (M, C) @ (C, ts) -> (M, ts): standard MXU dot, f32 accumulation.
    conv = jnp.dot(wct_ref[...], x, preferred_element_type=jnp.float32)
    conv = jnp.maximum(conv + bc_ref[...], 0.0)        # bias + ReLU in f32
    acc_ref[...] += jnp.sum(conv, axis=1, keepdims=True)  # running spatial sum

    @pl.when(s_idx == pl.num_programs(1) - 1)
    def _fin():
        pooled_ref[0] = acc_ref[...] * inv_s           # mean over H*W


def make_pool(B, C, S, M):
    # Biggest aligned spatial tile that divides S (per-step overhead ~0.35us,
    # so bigger tiles amortize better; VMEM use stays far under the limit).
    ts = _pick_tile(S, (1024, 512, 256, 128))
    ns = S // ts
    kernel = functools.partial(_pool_kernel, inv_s=1.0 / S)
    return pl.pallas_call(
        kernel,
        out_shape=jax.ShapeDtypeStruct((B, M, 1), jnp.float32),
        grid=(B, ns),
        in_specs=[
            pl.BlockSpec((1, C, ts), lambda b, s: (b, 0, s)),   # NCHW tile
            pl.BlockSpec((M, C), lambda b, s: (0, 0)),          # wc^T (bf16)
            pl.BlockSpec((M, 1), lambda b, s: (0, 0)),          # conv bias
        ],
        out_specs=pl.BlockSpec((1, M, 1), lambda b, s: (b, 0, 0)),
        scratch_shapes=[pltpu.VMEM((M, 1), jnp.float32)],
        compiler_params=pltpu.CompilerParams(
            dimension_semantics=("parallel", "arbitrary"),
            vmem_limit_bytes=VMEM_LIMIT),
    )


# ----------------------------------------------------------------------------
# Phase 2: projection head (per view): Linear -> BN -> ReLU -> Linear -> L2 norm
# ----------------------------------------------------------------------------
def _head_kernel(p_ref, w1_ref, b1_ref, g_ref, be_ref, w2_ref, b2_ref, out_ref):
    p = p_ref[0]                                                   # (B, M) f32
    h = jnp.dot(p.astype(MXU_DTYPE), w1_ref[...],
                preferred_element_type=jnp.float32) + b1_ref[...]

    # BatchNorm with training batch statistics (biased variance), per view.
    mu = jnp.mean(h, axis=0, keepdims=True)
    d = h - mu
    var = jnp.mean(d * d, axis=0, keepdims=True)
    h = d * lax.rsqrt(var + BN_EPS) * g_ref[...] + be_ref[...]
    h = jnp.maximum(h, 0.0)

    z = jnp.dot(h.astype(MXU_DTYPE), w2_ref[...],
                preferred_element_type=jnp.float32) + b2_ref[...]

    # L2 normalize along feature dim: z / max(||z||, eps)  (rsqrt on the EUP)
    ss = jnp.sum(z * z, axis=1, keepdims=True)
    out_ref[0] = z * lax.rsqrt(jnp.maximum(ss, NORM_EPS * NORM_EPS))


def make_head(B, M, D):
    return pl.pallas_call(
        _head_kernel,
        out_shape=jax.ShapeDtypeStruct((2, B, D), jnp.float32),
        grid=(2,),
        in_specs=[
            pl.BlockSpec((1, B, M), lambda v: (v, 0, 0)),  # pooled (per view)
            pl.BlockSpec((M, M), lambda v: (0, 0)),        # w1 (bf16)
            pl.BlockSpec((1, M), lambda v: (0, 0)),        # b1
            pl.BlockSpec((1, M), lambda v: (0, 0)),        # gamma
            pl.BlockSpec((1, M), lambda v: (0, 0)),        # beta
            pl.BlockSpec((M, D), lambda v: (0, 0)),        # w2 (bf16)
            pl.BlockSpec((1, D), lambda v: (0, 0)),        # b2
        ],
        out_specs=pl.BlockSpec((1, B, D), lambda v: (v, 0, 0)),
        compiler_params=pltpu.CompilerParams(
            dimension_semantics=("parallel",),
            vmem_limit_bytes=VMEM_LIMIT),
    )


# ----------------------------------------------------------------------------
# Phase 3: contrastive logits:  qk @ qk^T, diag <- MAX_NUM, * (1/T)
# ----------------------------------------------------------------------------
def _logits_kernel(row_ref, col_ref, out_ref, *, bm, bn, inv_t):
    # (bm, D) . (bn, D)^T via contracting-last dot_general (no transpose copy).
    s = lax.dot_general(row_ref[...], col_ref[...],
                        dimension_numbers=(((1,), (1,)), ((), ())),
                        preferred_element_type=jnp.float32)        # (bm, bn)
    r = pl.program_id(0) * bm + lax.broadcasted_iota(jnp.int32, (bm, bn), 0)
    c = pl.program_id(1) * bn + lax.broadcasted_iota(jnp.int32, (bm, bn), 1)
    out_ref[...] = jnp.where(r == c, MAX_NUM, s) * inv_t


def make_logits(N2, D, T):
    bm = _pick_tile(N2, (512, 256, 128))
    bn = _pick_tile(N2, (512, 256, 128))
    kernel = functools.partial(_logits_kernel, bm=bm, bn=bn, inv_t=1.0 / T)
    return pl.pallas_call(
        kernel,
        out_shape=jax.ShapeDtypeStruct((N2, N2), jnp.float32),
        grid=(N2 // bm, N2 // bn),
        in_specs=[
            pl.BlockSpec((bm, D), lambda i, j: (i, 0)),   # row tile of qk
            pl.BlockSpec((bn, D), lambda i, j: (j, 0)),   # col tile of qk
        ],
        out_specs=pl.BlockSpec((bm, bn), lambda i, j: (i, j)),
        compiler_params=pltpu.CompilerParams(
            dimension_semantics=("parallel", "parallel"),
            vmem_limit_bytes=VMEM_LIMIT),
    )


# ----------------------------------------------------------------------------
# SimCLR forward (training branch of the PyTorch module).
# ----------------------------------------------------------------------------
def simclr_forward(params, im_q, im_k, T=0.5):
    B, C, H, W = im_q.shape
    S = H * W
    M = params["w1"].shape[0]
    D = params["w2"].shape[1]

    # Weight layout prep (done once, tiny): conv weight transposed to (M, C)
    # so the in-kernel contraction over C is a standard MXU dot; bf16 operands.
    wct = jnp.transpose(params["wc"]).astype(MXU_DTYPE)        # (M, C)
    bc_col = params["bc"].reshape(M, 1).astype(jnp.float32)    # (M, 1)
    w1 = params["w1"].astype(MXU_DTYPE)
    w2 = params["w2"].astype(MXU_DTYPE)

    # Two independent pool calls (one per view): images are read exactly once
    # from HBM each, with no wrapper-side concat/transpose copy of the images.
    pool = make_pool(B, C, S, M)
    pooled_q = pool(im_q.reshape(B, C, S), wct, bc_col).reshape(B, M)
    pooled_k = pool(im_k.reshape(B, C, S), wct, bc_col).reshape(B, M)

    # Projection head for both views in one call (per-view BN stats inside).
    z = make_head(B, M, D)(
        jnp.stack([pooled_q, pooled_k], axis=0),
        w1, params["b1"], params["gamma"], params["beta"], w2, params["b2"])

    # concat_all_gather: identity for single-device (world_size == 1), and
    # cat([all_q, all_k], dim=0) is then just a free reshape of (2, B, D).
    # TODO(synk): cross-device all_gather (torch.distributed) not implemented.
    N = z.shape[1]
    N2 = 2 * N
    qk = z.reshape(N2, D).astype(MXU_DTYPE)                    # (2N, D)

    logits = make_logits(N2, D, T)(qk, qk)

    labels = jnp.concatenate(
        [jnp.arange(N, 2 * N), jnp.arange(0, N)]).astype(jnp.int32)
    # TODO(synk): eval branch (return normalize(encoder(im_q))) not emitted here.
    return logits, labels


# ----------------------------------------------------------------------------
# Deterministic parameter init + run.
# ----------------------------------------------------------------------------
def init_params(key, C, M, D):
    ks = jax.random.split(key, 4)
    scale = 0.1
    return {
        # 1x1 conv stem: (C_in, dim_mlp)
        "wc": scale * jax.random.normal(ks[0], (C, M), jnp.float32),
        "bc": jnp.zeros((1, M), jnp.float32),
        # projection head Linear(dim_mlp, dim_mlp)
        "w1": scale * jax.random.normal(ks[1], (M, M), jnp.float32),
        "b1": jnp.zeros((1, M), jnp.float32),
        # BatchNorm(dim_mlp) — running stats not tracked (pure forward).
        "gamma": jnp.ones((1, M), jnp.float32),
        "beta": jnp.zeros((1, M), jnp.float32),
        # final Linear(dim_mlp, dim)
        "w2": scale * jax.random.normal(ks[2], (M, D), jnp.float32),
        "b2": jnp.zeros((1, D), jnp.float32),
    }


if __name__ == "__main__":
    B, C, H, W = 2, 4, 16, 16        # small NCHW image batch
    dim_mlp, dim = 32, 8             # encoder feature width / projection dim
    T = 0.5

    key = jax.random.PRNGKey(0)
    k_q, k_k, k_p = jax.random.split(key, 3)

    im_q = jax.random.normal(k_q, (B, C, H, W), jnp.float32)
    im_k = jax.random.normal(k_k, (B, C, H, W), jnp.float32)
    params = init_params(k_p, C, dim_mlp, dim)

    logits, labels = simclr_forward(params, im_q, im_k, T=T)
    jax.block_until_ready((logits, labels))

    assert logits.shape == (2 * B, 2 * B)
    assert labels.shape == (2 * B,)
    print("KERNEL_OK")
</pallas_src>

<mosaic_0001>
module attributes {stable_mosaic.version = 11 : i64} {
  func.func @_pool_kernel(%arg0: i32, %arg1: i32, %arg2: memref<1x4x256xf32, #tpu.memory_space<vmem>>, %arg3: memref<32x4xbf16, #tpu.memory_space<vmem>>, %arg4: memref<32x1xf32, #tpu.memory_space<vmem>>, %arg5: memref<1x32x1xf32, #tpu.memory_space<vmem>>, %arg6: memref<32x1xf32, #tpu.memory_space<vmem>>) attributes {dimension_semantics = [#tpu.dimension_semantics<parallel>, #tpu.dimension_semantics<arbitrary>], iteration_bounds = array<i64: 2, 1>, scalar_prefetch = 0 : i64, scratch_operands = 1 : i64, tpu.core_type = #tpu.core_type<tc>, window_params = [{transform_indices = @transform_0, window_bounds = array<i64: 1, 4, 256>}, {pipeline_mode = #tpu.pipeline_mode<synchronous>, transform_indices = @transform_1, window_bounds = array<i64: 32, 4>}, {pipeline_mode = #tpu.pipeline_mode<synchronous>, transform_indices = @transform_2, window_bounds = array<i64: 32, 1>}, {transform_indices = @transform_3, window_bounds = array<i64: 1, 32, 1>}]} {
    %c0_i32 = arith.constant 0 : i32
    %0 = arith.cmpi eq, %arg1, %c0_i32 : i32
    %1 = arith.extui %0 : i1 to i32
    %c0_i32_0 = arith.constant 0 : i32
    %2 = arith.cmpi ne, %1, %c0_i32_0 : i32
    scf.if %2 {
      %cst_15 = arith.constant 0.000000e+00 : f32
      %21 = vector.broadcast %cst_15 : f32 to vector<32x1xf32>
      %c0_16 = arith.constant 0 : index
      %c0_17 = arith.constant 0 : index
      %22 = vector.load %arg6[%c0_16, %c0_17] : memref<32x1xf32, #tpu.memory_space<vmem>>, vector<32x1xf32>
      tpu.vector_store %arg6[%c0_16, %c0_17], %21 {strides = array<i32>} : memref<32x1xf32, #tpu.memory_space<vmem>>, vector<32x1xf32>,
    } else {
    }
    %c0 = arith.constant 0 : index
    %c0_1 = arith.constant 0 : index
    %c0_2 = arith.constant 0 : index
    %3 = vector.load %arg2[%c0, %c0_1, %c0_2] : memref<1x4x256xf32, #tpu.memory_space<vmem>>, vector<1x4x256xf32>
    %4 = vector.shape_cast %3 : vector<1x4x256xf32> to vector<4x256xf32>
    %5 = arith.truncf %4 : vector<4x256xf32> to vector<4x256xbf16>
    %c0_3 = arith.constant 0 : index
    %c0_4 = arith.constant 0 : index
    %6 = vector.load %arg3[%c0_3, %c0_4] : memref<32x4xbf16, #tpu.memory_space<vmem>>, vector<32x4xbf16>
    %cst = arith.constant dense<0.000000e+00> : vector<32x256xf32>
    %7 = tpu.matmul %6, %5, %cst {dimension_numbers = #tpu.dot_dimension_numbers<[1], [0], [0], [1], [0, 0, 1, 1], [], []>} : vector<32x4xbf16>, vector<4x256xbf16>, vector<32x256xf32> -> vector<32x256xf32>
    %c0_5 = arith.constant 0 : index
    %c0_6 = arith.constant 0 : index
    %8 = vector.load %arg4[%c0_5, %c0_6] : memref<32x1xf32, #tpu.memory_space<vmem>>, vector<32x1xf32>
    %9 = vector.broadcast %8 : vector<32x1xf32> to vector<32x256xf32>
    %10 = arith.addf %7, %9 : vector<32x256xf32>
    %cst_7 = arith.constant 0.000000e+00 : f32
    %11 = vector.broadcast %cst_7 : f32 to vector<32x256xf32>
    %12 = arith.maximumf %10, %11 : vector<32x256xf32>
    %c0_8 = arith.constant 0 : index
    %c0_9 = arith.constant 0 : index
    %13 = vector.load %arg6[%c0_8, %c0_9] : memref<32x1xf32, #tpu.memory_space<vmem>>, vector<32x1xf32>
    %cst_10 = arith.constant dense<0.000000e+00> : vector<32xf32>
    %14 = vector.multi_reduction <add>, %12, %cst_10 [1] : vector<32x256xf32> to vector<32xf32>
    %15 = vector.shape_cast %14 : vector<32xf32> to vector<32x1xf32>
    %16 = arith.addf %13, %15 : vector<32x1xf32>
    %c0_11 = arith.constant 0 : index
    %c0_12 = arith.constant 0 : index
    %17 = vector.load %arg6[%c0_11, %c0_12] : memref<32x1xf32, #tpu.memory_space<vmem>>, vector<32x1xf32>
    tpu.vector_store %arg6[%c0_11, %c0_12], %16 {strides = array<i32>} : memref<32x1xf32, #tpu.memory_space<vmem>>, vector<32x1xf32>,
    %c0_i32_13 = arith.constant 0 : i32
    %18 = arith.cmpi eq, %arg1, %c0_i32_13 : i32
    %19 = arith.extui %18 : i1 to i32
    %c0_i32_14 = arith.constant 0 : i32
    %20 = arith.cmpi ne, %19, %c0_i32_14 : i32
    scf.if %20 {
      %c0_15 = arith.constant 0 : index
      %c0_16 = arith.constant 0 : index
      %21 = vector.load %arg6[%c0_15, %c0_16] : memref<32x1xf32, #tpu.memory_space<vmem>>, vector<32x1xf32>
      %cst_17 = arith.constant 3.906250e-03 : f32
      %22 = vector.broadcast %cst_17 : f32 to vector<32x1xf32>
      %23 = arith.mulf %21, %22 : vector<32x1xf32>
      %c0_18 = arith.constant 0 : index
      %c0_19 = arith.constant 0 : index
      %c0_20 = arith.constant 0 : index
      %24 = vector.load %arg5[%c0_18, %c0_19, %c0_20] : memref<1x32x1xf32, #tpu.memory_space<vmem>>, vector<1x32x1xf32>
      %25 = vector.shape_cast %24 : vector<1x32x1xf32> to vector<32x1xf32>
      %26 = vector.shape_cast %23 : vector<32x1xf32> to vector<1x32x1xf32>
      tpu.vector_store %arg5[%c0_18, %c0_19, %c0_20], %26 {strides = array<i32>} : memref<1x32x1xf32, #tpu.memory_space<vmem>>, vector<1x32x1xf32>,
    } else {
    }
    return
  }
  func.func @transform_0(%arg0: i32, %arg1: i32) -> (i32, i32, i32) {
    %c0_i32 = arith.constant 0 : i32
    %c0_i32_0 = arith.constant 0 : i32
    return %arg0, %c0_i32, %arg1 : i32, i32, i32
  }
  func.func @transform_1(%arg0: i32, %arg1: i32) -> (i32, i32) {
    %c0_i32 = arith.constant 0 : i32
    %c0_i32_0 = arith.constant 0 : i32
    %c0_i32_1 = arith.constant 0 : i32
    return %c0_i32, %c0_i32_0 : i32, i32
  }
  func.func @transform_2(%arg0: i32, %arg1: i32) -> (i32, i32) {
    %c0_i32 = arith.constant 0 : i32
    %c0_i32_0 = arith.constant 0 : i32
    %c0_i32_1 = arith.constant 0 : i32
    return %c0_i32, %c0_i32_0 : i32, i32
  }
  func.func @transform_3(%arg0: i32, %arg1: i32) -> (i32, i32, i32) {
    %c0_i32 = arith.constant 0 : i32
    %c0_i32_0 = arith.constant 0 : i32
    %c0_i32_1 = arith.constant 0 : i32
    return %arg0, %c0_i32, %c0_i32_0 : i32, i32, i32
  }
}

</mosaic_0001>

<bundles_post_ra>
// kernel: tpu_custom_call.1
= control target key start
LH: loop header
LB: loop body
LE: loop exit
PB: predicated region body
PF: predicated region fallthrough
CT: control target
= control target key end

     0   :  { %s528_s12 = smov 0   ;;  %s530_s13 = smov 0   ;;  %s595_s0 = inlined_call_operand.vmem [shape: f32[2,4,256], index: 0, kind: input, shape index: {}]   ;;  %s596_s1 = inlined_call_operand.vmem [shape: bf16[32,4], index: 1, kind: input, shape index: {}]   ;;  %s597_s2 = inlined_call_operand.vmem [shape: f32[32,1], index: 2, kind: input, shape index: {}]   ;;  %s598_s3 = inlined_call_operand.vmem [shape: f32[2,32,1], index: 3, kind: output, shape index: {}]  }
   0x1   :  { %s532_s14 = smov 0  }
   0x2 LB: > { %s25_s15 = sadd.s32 1, %s500_s13  ;;  %p429_p0 = scmp.ge.s32.totalorder %s504_s14, 1  ;;  %s504_s14 = sphi %s532_s14, %s13_s14   ;;  %s500_s13 = sphi %s530_s13, %s600_s13   ;;  %s496_s12 = sphi %s528_s12, %s599_s12  }
   0x3   : > { %p27_p1 = scmp.ge.s32.totalorder %s25_s15, 2  ;;  %p156_p2 = scmp.lt.s32.totalorder %s504_s14, 3 }
   0x5   : > { %s602_s15 = smov (%p27_p1, %s25_s15), 0  ;;  %p157_p3 = pnand %p429_p0, %p156_p2 }
   0x6   : > { %p185_p4 = scmp.lt.s32.totalorder (!%p157_p3), %s496_s12, 1 }
   0x7   : > { %160 = sbr.rel (%p157_p3) target bundleno = 306 (0x132), region = 32 }
   0xc   : > { %v506_v0 = vmov 0   ;;  %v224_v1 = vld [vmem:[%s597_s2 + $0x10] sm:$0xff]  ;;  %v222_v2 = vld [vmem:[%s597_s2] sm:$0xff]  ;;  %s604_s12 = smov (!%p185_p4, %s496_s12), 1  ;;  %v225_v4 = vld [vmem:[%s597_s2 + $0x18] sm:$0xff]  ;;  %vm263_vm0 = vcmask 1041408  }
   0xd   : > { %481 = vset.pattern.permute.xlu1 %v506_v0  ;;  %480 = vset.pattern.permute.xlu0 %v506_v0  ;;  %s448_s20 = sshll.u32 %s604_s12, 3  ;;  %v223_v5 = vld [vmem:[%s597_s2 + $0x8] sm:$0xff]  ;;  %v450_v12 = vld [vmem:[%s596_s1] sm:$0xff]  ;;  %vm256_vm1 = vcmask 31744   ;;  %vm204_vm2 = vcmask 7168   ;;  %v507_v14 = vmov 0.0  }
   0xe   : > { %238 = vperm.xlu1 %481, %v224_v1   ;;  %228 = vperm.xlu0 %480, %v222_v2   ;;  %s192_s23 = scalar_lea.vmem %s595_s0, %s448_s20  ;;  %v451_v13 = vld [vmem:[%s596_s1 + $0x8] sm:$0xff]  ;;  %205 = vst.msk [vmem:[#allocation2] sm:$0xff] %vm204_vm2, %v507_v14  ;;  %s449_s5 = sshll.u32 %s604_s12, 5 }
   0xf   : > { %v209_v3 = vld [vmem:[%s192_s23] sm:$0xff]  ;;  %206 = vst.msk [vmem:[#allocation2 + $0x8] sm:$0xff] %vm204_vm2, %v507_v14  ;;  %s198_s8 = scalar_lea.vmem %s598_s3, %s449_s5 }
  0x10   : > { %211 = vst [vmem:[#allocation1] ss:$2 sm:$0xff] %v209_v3 }
  0x11   : > { %207 = vst.msk [vmem:[#allocation2 + $0x10] sm:$0xff] %vm204_vm2, %v507_v14 }
  0x12   : > { %208 = vst.msk [vmem:[#allocation2 + $0x18] sm:$0xff] %vm204_vm2, %v507_v14 }
  0x15   : > { %v316_v47 = vld [vmem:[#allocation2] sm:$0xff] }
  0x16   : > { %243 = vperm.xlu1 %481, %v225_v4   ;;  %233 = vperm.xlu0 %480, %v223_v5   ;;  %v317_v52 = vld [vmem:[#allocation2 + $0x8] sm:$0xff] }
  0x17   : > { %v212_v6 = vld.sshfl [vmem:[#allocation1] sm:$0xff pattern:$0x75316420]  ;;  %v213_v7 = vld.sshfl [vmem:[#allocation1 + $0x8] sm:$0xff pattern:$0x75316420] }
  0x18   : > { %v216_v8 = vpack.c.bf16 %v212_v6, %v212_v6  ;;  %v217_v9 = vpack.c.bf16 %v213_v7, %v213_v7  ;;  %v318_v50 = vld [vmem:[#allocation2 + $0x10] sm:$0xff] }
  0x19   : > { %v319_v58 = vld [vmem:[#allocation2 + $0x18] sm:$0xff] }
  0x1a   : > { %v265_v10 = vsel %vm263_vm0, %v216_v8, 0  ;;  %v268_v11 = vsel %vm263_vm0, %v217_v9, 0 }
  0x1b   : > { %277 = vmatpush.bf16.msra.mxu0 %v265_v10  ;;  %452 = vmatpush.bf16.msra.mxu2 %v265_v10 }
  0x1c   : > { %296 = vmatpush.bf16.msra.mxu1 %v268_v11  ;;  %453 = vmatpush.bf16.msra.mxu3 %v268_v11 }
  0x1e   : > { %442 = vmatmul.msk.bf16.vlgmr.msra.gmra.mxu0 %vm256_vm1, %v450_v12  ;;  %443 = vmatmul.msk.bf16.vlgmr.msra.gmra.mxu2 %vm256_vm1, %v451_v13 }
  0x1f   : > { %444 = vmatmul.msk.bf16.vlgmr.msra.gmra.mxu1 %vm256_vm1, %v450_v12  ;;  %445 = vmatmul.msk.bf16.vlgmr.msra.gmra.mxu3 %vm256_vm1, %v451_v13 }
  0x80   : > { %v229_v15 = vpop.permute.xlu0 %228  ;;  %v239_v21 = vpop.permute.xlu1 %238 }
  0x88   : > { %v234_v27 = vpop.permute.xlu0 %233  ;;  %v244_v38 = vpop.permute.xlu1 %243 }
  0x9b   : > { %v279_v16 = vpop.f32.mrf.mxu0 }
  0x9c   : > { %v280_v17 = vadd.f32 %v279_v16, %v229_v15  ;;  %v298_v18 = vpop.f32.mrf.mxu1 }
  0x9d   : > { %v299_v19 = vadd.f32 %v298_v18, %v229_v15 }
  0x9e   : > { %v308_v20 = vmax.f32 %v280_v17, 0.0 }
  0x9f   : > { %v309_v22 = vmax.f32 %v299_v19, 0.0 }
  0xa1   : > { %v284_v23 = vpop.f32.mrf.mxu2  ;;  %v320_v24 = vadd.f32 %v309_v22, %v308_v20 }
  0xa2   : > { %v285_v25 = vadd.f32 %v284_v23, %v239_v21  ;;  %v303_v26 = vpop.f32.mrf.mxu3 }
  0xa3   : > { %v304_v28 = vadd.f32 %v303_v26, %v239_v21  ;;  %321 = vadd.xlane.f32.xlu2 %v320_v24  ;;  %v281_v29 = vpop.f32.mrf.mxu0 }
  0xa4   : > { %v312_v30 = vmax.f32 %v285_v25, 0.0  ;;  %v282_v31 = vadd.f32 %v281_v29, %v234_v27  ;;  %v300_v32 = vpop.f32.mrf.mxu1 }
  0xa5   : > { %v313_v33 = vmax.f32 %v304_v28, 0.0  ;;  %v301_v34 = vadd.f32 %v300_v32, %v234_v27 }
  0xa6   : > { %v310_v35 = vmax.f32 %v282_v31, 0.0 }
  0xa7   : > { %v311_v36 = vmax.f32 %v301_v34, 0.0  ;;  %v326_v37 = vadd.f32 %v313_v33, %v312_v30 }
  0xa9   : > { %327 = vadd.xlane.f32.xlu0 %v326_v37  ;;  %v286_v39 = vpop.f32.mrf.mxu2  ;;  %v323_v40 = vadd.f32 %v311_v36, %v310_v35 }
  0xaa   : > { %v287_v41 = vadd.f32 %v286_v39, %v244_v38  ;;  %v305_v42 = vpop.f32.mrf.mxu3 }
  0xab   : > { %v306_v43 = vadd.f32 %v305_v42, %v244_v38  ;;  %324 = vadd.xlane.f32.xlu2 %v323_v40 }
  0xac   : > { %v314_v44 = vmax.f32 %v287_v41, 0.0 }
  0xad   : > { %v315_v45 = vmax.f32 %v306_v43, 0.0 }
  0xaf   : > { %v329_v46 = vadd.f32 %v315_v45, %v314_v44 }
  0xb1   : > { %330 = vadd.xlane.f32.xlu1 %v329_v46 }
 0x116   : > { %v322_v48 = vpop.xlane.xlu2 %321 }
 0x117   : > { %v332_v49 = vadd.f32 %v322_v48, %v316_v47 }
 0x119   : > { %337 = vst.msk [vmem:[#allocation2] sm:$0xff] %vm204_vm2, %v332_v49 }
 0x11c   : > { %v328_v51 = vpop.xlane.xlu0 %327 }
 0x11d   : > { %v334_v53 = vadd.f32 %v328_v51, %v318_v50 }
 0x11e   : > { %v325_v54 = vpop.xlane.xlu2 %324 }
 0x11f   : > { %339 = vst.msk [vmem:[#allocation2 + $0x10] sm:$0xff] %vm204_vm2, %v334_v53  ;;  %v333_v55 = vadd.f32 %v325_v54, %v317_v52 }
 0x120   : > { %v344_v56 = vld [vmem:[#allocation2] sm:$0xff] }
 0x121   : > { %v348_v57 = vmul.f32 0.00390625, %v344_v56  ;;  %338 = vst.msk [vmem:[#allocation2 + $0x8] sm:$0xff] %vm204_vm2, %v333_v55 }
 0x123   : > { %352 = vst.msk [vmem:[%s198_s8] sm:$0xff] %vm204_vm2, %v348_v57 }
 0x124   : > { %v331_v59 = vpop.xlane.xlu1 %330 }
 0x125   : > { %v335_v60 = vadd.f32 %v331_v59, %v319_v58 }
 0x126   : > { %v346_v61 = vld [vmem:[#allocation2 + $0x10] sm:$0xff] }
 0x127   : > { %v350_v62 = vmul.f32 0.00390625, %v346_v61  ;;  %340 = vst.msk [vmem:[#allocation2 + $0x18] sm:$0xff] %vm204_vm2, %v335_v60 }
 0x128   : > { %v345_v63 = vld [vmem:[#allocation2 + $0x8] sm:$0xff] }
 0x129   : > { %354 = vst.msk [vmem:[%s198_s8 + $0x10] sm:$0xff] %vm204_vm2, %v350_v62  ;;  %v349_v0 = vmul.f32 0.00390625, %v345_v63 }
 0x12b   : > { %353 = vst.msk [vmem:[%s198_s8 + $0x8] sm:$0xff] %vm204_vm2, %v349_v0 }
 0x12e   : > { %v347_v1 = vld [vmem:[#allocation2 + $0x18] sm:$0xff] }
 0x12f   : > { %v351_v2 = vmul.f32 0.00390625, %v347_v1 }
 0x131   : > { %355 = vst.msk [vmem:[%s198_s8 + $0x18] sm:$0xff] %vm204_vm2, %v351_v2 }
 0x132 PF: > { %s13_s14 = sadd.s32 1, %s504_s14   ;;  %s599_s12 = smov %s500_s13 }
 0x133   : > { %p10_p5 = scmp.ge.s32.totalorder %s13_s14, 4   ;;  %s600_s13 = smov %s602_s15 }
 0x135   :  { %12 = sbr.rel (!%p10_p5) target bundleno = 2 (0x2), region = 70 }

</bundles_post_ra>
